<compile_context>
chip_gen: v7x
topology: tpu7x:2x2x1
jax: 0.10.0
libtpu: 0.0.40
codegen_flags: <defaults>
</compile_context>

<pallas_src>
import functools

import jax
import jax.numpy as jnp
from jax.experimental import pallas as pl
from jax.experimental.pallas import tpu as pltpu


def _round_up(x: int, m: int) -> int:
    return (x + m - 1) // m * m


def _row_abs_mean_kernel(x_ref, out_ref, acc_ref, *, inv_hw, hw, hw_chunk, needs_mask):
    # x_ref:   (TILE_NC, HW_CHUNK) block of the input, native dtype, VMEM.
    # out_ref: (TILE_NC, 1) f32 |row mean|, resident across the HW grid axis.
    # acc_ref: (TILE_NC, 1) f32 scratch accumulator.
    k = pl.program_id(1)

    @pl.when(k == 0)
    def _():
        acc_ref[...] = jnp.zeros_like(acc_ref)

    x = x_ref[...].astype(jnp.float32)                   # cast in-kernel, f32 accumulate
    if needs_mask:
        # The last HW chunk extends past H*W: zero the out-of-range columns.
        col = jax.lax.broadcasted_iota(jnp.int32, x.shape, 1)
        x = jnp.where(k * hw_chunk + col < hw, x, 0.0)
    acc_ref[...] += jnp.sum(x, axis=1, keepdims=True)    # VPU vreg adds + one XLU reduce

    @pl.when(k == pl.num_programs(1) - 1)
    def _():
        out_ref[...] = jnp.abs(acc_ref[...] * inv_hw)


_TILE_BYTES_DEFAULT = 8 * 1024 * 1024   # per input tile; double-buffered stays << 32 MiB
_MIN_PARALLEL_STEPS = 4                 # give v7x's 2 TCs something to shard


def _input_abs_means(x2d, *, tile_bytes=_TILE_BYTES_DEFAULT):
    """Tiled Pallas row reduction: |mean over last axis| per row of x2d.

    x2d: (NC, HW), any float dtype. Returns (NC, 1) float32.
    """
    nc, hw = x2d.shape
    itemsize = x2d.dtype.itemsize
    sublane = {4: 8, 2: 16, 1: 32}.get(itemsize, 8)      # dtype-native row packing
    row_bytes = _round_up(hw, 128) * itemsize            # lane-padded footprint per row

    rows_budget = tile_bytes // row_bytes
    if rows_budget >= sublane:
        # Full H*W per block; tile over NC only.
        tile_nc = (rows_budget // sublane) * sublane
        # Cap so the "parallel" axis has >= _MIN_PARALLEL_STEPS steps when NC allows.
        cap = _round_up(pl.cdiv(nc, _MIN_PARALLEL_STEPS), sublane)
        tile_nc = max(sublane, min(tile_nc, cap))
        tile_nc = min(tile_nc, _round_up(nc, sublane))
        hw_chunk, num_hw = hw, 1
    else:
        # H*W too large even for a minimal row tile: chunk HW (accumulator path).
        tile_nc = sublane
        hw_chunk = max(128, (tile_bytes // (tile_nc * itemsize)) // 128 * 128)
        if hw_chunk >= hw:
            hw_chunk, num_hw = hw, 1                     # full extent, no OOB columns
        else:
            num_hw = pl.cdiv(hw, hw_chunk)
    needs_mask = (num_hw > 1) and (hw % hw_chunk != 0)

    num_nc = pl.cdiv(nc, tile_nc)
    padded_nc = num_nc * tile_nc

    out = pl.pallas_call(
        functools.partial(
            _row_abs_mean_kernel,
            inv_hw=1.0 / hw, hw=hw, hw_chunk=hw_chunk, needs_mask=needs_mask,
        ),
        out_shape=jax.ShapeDtypeStruct((padded_nc, 1), jnp.float32),
        grid=(num_nc, num_hw),
        in_specs=[pl.BlockSpec((tile_nc, hw_chunk), lambda i, k: (i, k))],
        out_specs=pl.BlockSpec((tile_nc, 1), lambda i, k: (i, 0)),
        scratch_shapes=[pltpu.VMEM((tile_nc, 1), jnp.float32)],
        compiler_params=pltpu.CompilerParams(
            dimension_semantics=("parallel", "arbitrary"),
            vmem_limit_bytes=32 * 1024 * 1024,           # valid on v5e/v6e/v7x alike
        ),
    )(x2d)

    # Rows past NC (partially out-of-bounds last NC tile) are garbage; drop them.
    return out[:nc, :]


def _moment1_abs(x):
    """|compute_i_th_moment(x, 1)| flattened to (N*C, 1). Init-time / reference."""
    n, c, h, w = x.shape
    return jnp.abs(jnp.mean(x.astype(jnp.float32).reshape(n * c, h * w),
                            axis=1, keepdims=True))


def init_style_loss_mean(target):
    """Module '__init__': precompute target-only stats (|moment1| and factor)."""
    target_mean = _moment1_abs(target)                                    # (N*C, 1)
    factor = jnp.minimum(1.0 / jnp.mean(target_mean), jnp.float32(1.0))   # scalar
    return target_mean, factor


def style_loss_mean(x, target_mean_flat, factor):
    """forward(): returns (loss, x_passthrough). x: (N, C, H, W)."""
    n, c, h, w = x.shape
    x2d = x.reshape(n * c, h * w)                  # no dtype upcast in the wrapper
    input_mean = _input_abs_means(x2d)             # (N*C, 1) f32 via Pallas kernel
    diff = input_mean - target_mean_flat.astype(jnp.float32)
    mse = jnp.mean(diff * diff)                    # O(N*C) epilogue in plain JAX
    loss = jnp.abs(factor) * mse                   # abs kept for exact parity
    return loss, x


if __name__ == "__main__":
    key = jax.random.PRNGKey(0)
    k_t, k_x, k_b = jax.random.split(key, 3)

    N, C, H, W = 2, 4, 16, 16
    target = jax.random.normal(k_t, (N, C, H, W), dtype=jnp.float32)
    x = jax.random.normal(k_x, (N, C, H, W), dtype=jnp.float32)

    # "__init__": target-only precompute (|first moment| and balancing factor).
    target_mean_flat, factor = init_style_loss_mean(target)

    loss, out = jax.jit(style_loss_mean)(x, target_mean_flat, factor)
    jax.block_until_ready(loss)
    jax.block_until_ready(out)

    # Pure-JAX reference check of the loss value.
    input_mean_ref = _moment1_abs(x)
    factor_ref = jnp.minimum(1.0 / jnp.mean(target_mean_flat), 1.0)
    loss_ref = jnp.abs(factor_ref) * jnp.mean((input_mean_ref - target_mean_flat) ** 2)
    assert jnp.allclose(loss, loss_ref, rtol=1e-5, atol=1e-6), (loss, loss_ref)
    assert out.shape == x.shape and out.dtype == x.dtype

    # Exercise the HW-chunked accumulator path (non-divisible last chunk -> in-kernel
    # masking) plus a partial trailing NC tile, by shrinking the tile budget.
    x2 = jax.random.normal(k_b, (12, 324), dtype=jnp.float32)
    got2 = jax.block_until_ready(_input_abs_means(x2, tile_bytes=8192))
    ref2 = jnp.abs(jnp.mean(x2, axis=1, keepdims=True))
    assert jnp.allclose(got2, ref2, rtol=1e-5, atol=1e-6), (got2, ref2)

    # Exercise the bf16 (sublane=16) path: native-dtype DMA, in-kernel f32 accumulate.
    x3 = jax.random.normal(k_b, (12, 324), dtype=jnp.float32).astype(jnp.bfloat16)
    got3 = jax.block_until_ready(_input_abs_means(x3))
    ref3 = jnp.abs(jnp.mean(x3.astype(jnp.float32), axis=1, keepdims=True))
    assert jnp.allclose(got3, ref3, rtol=1e-4, atol=1e-6), (got3, ref3)

    print("KERNEL_OK")
</pallas_src>

<mosaic_0001>
module attributes {stable_mosaic.version = 11 : i64} {
  func.func @_row_abs_mean_kernel(%arg0: i32, %arg1: i32, %arg2: memref<8x256xf32, #tpu.memory_space<vmem>>, %arg3: memref<8x1xf32, #tpu.memory_space<vmem>>, %arg4: memref<8x1xf32, #tpu.memory_space<vmem>>) attributes {dimension_semantics = [#tpu.dimension_semantics<parallel>, #tpu.dimension_semantics<arbitrary>], iteration_bounds = array<i64: 1, 1>, scalar_prefetch = 0 : i64, scratch_operands = 1 : i64, tpu.core_type = #tpu.core_type<tc>, window_params = [{transform_indices = @transform_0, window_bounds = array<i64: 8, 256>}, {transform_indices = @transform_1, window_bounds = array<i64: 8, 1>}]} {
    %c0_i32 = arith.constant 0 : i32
    %0 = arith.cmpi eq, %arg1, %c0_i32 : i32
    %1 = arith.extui %0 : i1 to i32
    %c0_i32_0 = arith.constant 0 : i32
    %2 = arith.cmpi ne, %1, %c0_i32_0 : i32
    scf.if %2 {
      %cst_8 = arith.constant 0.000000e+00 : f32
      %12 = vector.broadcast %cst_8 : f32 to vector<8x1xf32>
      %c0_9 = arith.constant 0 : index
      %c0_10 = arith.constant 0 : index
      %13 = vector.load %arg4[%c0_9, %c0_10] : memref<8x1xf32, #tpu.memory_space<vmem>>, vector<8x1xf32>
      tpu.vector_store %arg4[%c0_9, %c0_10], %12 {strides = array<i32>} : memref<8x1xf32, #tpu.memory_space<vmem>>, vector<8x1xf32>,
    } else {
    }
    %c0 = arith.constant 0 : index
    %c0_1 = arith.constant 0 : index
    %3 = vector.load %arg2[%c0, %c0_1] : memref<8x256xf32, #tpu.memory_space<vmem>>, vector<8x256xf32>
    %c0_2 = arith.constant 0 : index
    %c0_3 = arith.constant 0 : index
    %4 = vector.load %arg4[%c0_2, %c0_3] : memref<8x1xf32, #tpu.memory_space<vmem>>, vector<8x1xf32>
    %cst = arith.constant dense<0.000000e+00> : vector<8xf32>
    %5 = vector.multi_reduction <add>, %3, %cst [1] : vector<8x256xf32> to vector<8xf32>
    %6 = vector.shape_cast %5 : vector<8xf32> to vector<8x1xf32>
    %7 = arith.addf %4, %6 : vector<8x1xf32>
    %c0_4 = arith.constant 0 : index
    %c0_5 = arith.constant 0 : index
    %8 = vector.load %arg4[%c0_4, %c0_5] : memref<8x1xf32, #tpu.memory_space<vmem>>, vector<8x1xf32>
    tpu.vector_store %arg4[%c0_4, %c0_5], %7 {strides = array<i32>} : memref<8x1xf32, #tpu.memory_space<vmem>>, vector<8x1xf32>,
    %c0_i32_6 = arith.constant 0 : i32
    %9 = arith.cmpi eq, %arg1, %c0_i32_6 : i32
    %10 = arith.extui %9 : i1 to i32
    %c0_i32_7 = arith.constant 0 : i32
    %11 = arith.cmpi ne, %10, %c0_i32_7 : i32
    scf.if %11 {
      %c0_8 = arith.constant 0 : index
      %c0_9 = arith.constant 0 : index
      %12 = vector.load %arg4[%c0_8, %c0_9] : memref<8x1xf32, #tpu.memory_space<vmem>>, vector<8x1xf32>
      %cst_10 = arith.constant 3.906250e-03 : f32
      %13 = vector.broadcast %cst_10 : f32 to vector<8x1xf32>
      %14 = arith.mulf %12, %13 : vector<8x1xf32>
      %15 = math.absf %14 : vector<8x1xf32>
      %c0_11 = arith.constant 0 : index
      %c0_12 = arith.constant 0 : index
      %16 = vector.load %arg3[%c0_11, %c0_12] : memref<8x1xf32, #tpu.memory_space<vmem>>, vector<8x1xf32>
      tpu.vector_store %arg3[%c0_11, %c0_12], %15 {strides = array<i32>} : memref<8x1xf32, #tpu.memory_space<vmem>>, vector<8x1xf32>,
    } else {
    }
    return
  }
  func.func @transform_0(%arg0: i32, %arg1: i32) -> (i32, i32) {
    %c0_i32 = arith.constant 0 : i32
    return %arg0, %arg1 : i32, i32
  }
  func.func @transform_1(%arg0: i32, %arg1: i32) -> (i32, i32) {
    %c0_i32 = arith.constant 0 : i32
    %c0_i32_0 = arith.constant 0 : i32
    return %arg0, %c0_i32 : i32, i32
  }
}

</mosaic_0001>

<bundles_post_ra>
// kernel: style_loss_mean.1
= control target key start
LH: loop header
LB: loop body
LE: loop exit
PB: predicated region body
PF: predicated region fallthrough
CT: control target
= control target key end

     0   :  { %vm12_vm0 = vcmask 7168   ;;  %v35_v2 = vmov 0.0   ;;  %s55_s0 = inlined_call_operand.vmem [shape: f32[8,256], index: 0, kind: input, shape index: {}]   ;;  %s56_s1 = inlined_call_operand.vmem [shape: f32[8,1], index: 1, kind: output, shape index: {}]  }
   0x1   :  { %v14_v0 = vld [vmem:[%s55_s0] sm:$0xff]  ;;  %v15_v1 = vld [vmem:[%s55_s0 + $0x8] sm:$0xff]  ;;  %13 = vst.msk [vmem:[#allocation2] sm:$0xff] %vm12_vm0, %v35_v2 }
   0x2   :  { %v17_v3 = vadd.f32 %v15_v1, %v14_v0 }
   0x4   :  { %18 = vadd.xlane.f32.xlu0 %v17_v3 }
   0x8   :  { %v16_v4 = vld [vmem:[#allocation2] sm:$0xff] }
  0x91   :  { %v19_v5 = vpop.xlane.xlu0 %18 }
  0x92   :  { %v20_v6 = vadd.f32 %v19_v5, %v16_v4 }
  0x94   :  { %22 = vst.msk [vmem:[#allocation2] sm:$0xff] %vm12_vm0, %v20_v6 }
  0x9b   :  { %v26_v7 = vld [vmem:[#allocation2] sm:$0xff] }
  0x9c   :  { %v27_v8 = vmul.f32 0.00390625, %v26_v7 }
  0x9e   :  { %v28_v9 = vand.u32 2147483647, %v27_v8 }
  0xa0   :  { %29 = vst.msk [vmem:[%s56_s1] sm:$0xff] %vm12_vm0, %v28_v9 }

</bundles_post_ra>
